<compile_context>
chip_gen: v7x
topology: tpu7x:2x2x1
jax: 0.10.0
libtpu: 0.0.40
codegen_flags: <defaults>
</compile_context>

<pallas_src>
import math
from functools import partial

import jax
import jax.numpy as jnp
from jax import lax
from jax.experimental import pallas as pl
from jax.experimental.pallas import tpu as pltpu


def _dft_kernel(x_ref, basis_ref, out_ref):
    # x_ref:     (tm, G*N)     G grouped signals per row (lane-dense, K = G*N)
    # basis_ref: (G*N, 2*G*N)  block-diagonal ortho DFT basis (VMEM-resident)
    # out_ref:   (tm, 2*G*N)   per-signal [Re(N), Im(N)] chunks (lane-dense)
    out_ref[...] = jnp.dot(
        x_ref[...], basis_ref[...], preferred_element_type=jnp.float32
    )


def _vmem_limit_bytes():
    """Generation-aware scoped-VMEM request (v7x has only 64 MiB / TC)."""
    cap = None
    get_info = getattr(pltpu, "get_tpu_info", None)
    if get_info is not None:
        try:
            cap = int(get_info().vmem_capacity_bytes)
        except Exception:
            cap = None
    if cap is None:
        cap = 64 * 1024 * 1024  # conservative (v7x-sized) default
    # Leave headroom for Mosaic-internal scratch: half of physical, <= 48 MiB.
    return int(min(cap // 2, 48 * 1024 * 1024))


_VMEM_LIMIT = _vmem_limit_bytes()


def _choose_tile_rows(m_rows, in_cols, out_cols):
    """Rows per grid step: big enough to amortize the ~0.35us/step overhead,
    small enough to double-buffer inside the VMEM budget, and >= 2 tiles when
    possible so the 'parallel' axis load-balances across v7x's two cores."""
    row_bytes = (in_cols + out_cols) * 4
    budget = min(_VMEM_LIMIT // 2, 16 * 1024 * 1024)   # double-buffered in+out
    tm = budget // max(2 * row_bytes, 1)
    tm = max(8, min(tm, 8192))
    tm = (tm // 8) * 8
    if m_rows < 8:
        return m_rows                                   # single full-extent tile
    if tm >= m_rows:
        if m_rows >= 16:
            tm = -(-m_rows // 2)                        # split across 2 cores
            tm = -(-tm // 8) * 8
        else:
            tm = m_rows
    return min(tm, m_rows)


@jax.jit
def _dft_layer_impl(x):
    orig_shape = x.shape
    N = orig_shape[-1]
    M = math.prod(orig_shape[:-1]) if len(orig_shape) > 1 else 1

    x_flat = x.reshape(M, N).astype(jnp.float32)

    # Group G consecutive signals per kernel row (free row-major reshape) so
    # the contraction dim is 128 and the output last dim is 2*G*N (lane-dense).
    G = 128 // N if (N <= 128 and 128 % N == 0) else 1

    m_rows = -(-M // G)
    m_pad = m_rows * G
    if m_pad != M:
        # Tiny pad (< G rows of N scalars) only when M is not a multiple of G.
        x_flat = jnp.pad(x_flat, ((0, m_pad - M), (0, 0)))
    x_grp = x_flat.reshape(m_rows, G * N)

    # Ortho DFT basis (N, 2N): columns [cos | -sin], W[n,k]=exp(-2pi i nk/N)/sqrt(N).
    # Integer (n*k) mod N before scaling keeps f32 twiddle precision for large N.
    n = jnp.arange(N, dtype=jnp.int32)
    nk = (n[:, None] * n[None, :]) % N
    angle = (2.0 * jnp.pi / N) * nk.astype(jnp.float32)
    scale = 1.0 / jnp.sqrt(jnp.float32(N))
    basis_t = jnp.concatenate(
        [jnp.cos(angle) * scale, -jnp.sin(angle) * scale], axis=1
    )                                                     # (N, 2N)
    big_basis = jnp.kron(jnp.eye(G, dtype=jnp.float32), basis_t)  # (G*N, 2*G*N)

    in_cols = G * N
    out_cols = 2 * G * N
    tm = _choose_tile_rows(m_rows, in_cols, out_cols)
    num_tiles = pl.cdiv(m_rows, tm)

    out_grp = pl.pallas_call(
        _dft_kernel,
        out_shape=jax.ShapeDtypeStruct((m_rows, out_cols), jnp.float32),
        grid=(num_tiles,),
        in_specs=[
            pl.BlockSpec((tm, in_cols), lambda i: (i, 0)),        # streamed rows
            pl.BlockSpec((in_cols, out_cols), lambda i: (0, 0)),  # VMEM-resident basis
        ],
        out_specs=pl.BlockSpec((tm, out_cols), lambda i: (i, 0)),
        compiler_params=pltpu.CompilerParams(
            dimension_semantics=("parallel",),    # megacore-shardable row tiles
            vmem_limit_bytes=_VMEM_LIMIT,
        ),
    )(x_grp, big_basis)

    out2 = out_grp.reshape(m_pad, 2 * N)[:M]      # free reshape; slice is no-op when m_pad==M
    re = out2[:, :N]
    im = out2[:, N:]
    return lax.complex(re, im).reshape(orig_shape)


def dft_layer(x):
    """Equivalent of torch.fft.fft(x, norm='ortho') for real float32 input x."""
    return _dft_layer_impl(x)


if __name__ == "__main__":
    key = jax.random.PRNGKey(0)
    # Small NCHW-shaped input consistent with a conv-style pipeline.
    x = jax.random.normal(key, (2, 4, 16, 16), dtype=jnp.float32)

    out = dft_layer(x)
    out = jax.block_until_ready(out)

    # Reference check against jnp.fft.fft with ortho normalization.
    ref = jnp.fft.fft(x, norm="ortho")
    assert out.shape == ref.shape
    assert jnp.allclose(out.real, ref.real, atol=1e-4, rtol=1e-4)
    assert jnp.allclose(out.imag, ref.imag, atol=1e-4, rtol=1e-4)

    print("KERNEL_OK")
</pallas_src>

<mosaic_0001>
module attributes {stable_mosaic.version = 11 : i64} {
  func.func @_dft_kernel(%arg0: i32, %arg1: memref<8x128xf32, #tpu.memory_space<vmem>>, %arg2: memref<128x256xf32, #tpu.memory_space<vmem>>, %arg3: memref<8x256xf32, #tpu.memory_space<vmem>>) attributes {dimension_semantics = [#tpu.dimension_semantics<parallel>], iteration_bounds = array<i64: 2>, scalar_prefetch = 0 : i64, scratch_operands = 0 : i64, tpu.core_type = #tpu.core_type<tc>, window_params = [{transform_indices = @transform_0, window_bounds = array<i64: 8, 128>}, {pipeline_mode = #tpu.pipeline_mode<synchronous>, transform_indices = @transform_1, window_bounds = array<i64: 128, 256>}, {transform_indices = @transform_2, window_bounds = array<i64: 8, 256>}]} {
    %c0 = arith.constant 0 : index
    %c0_0 = arith.constant 0 : index
    %0 = vector.load %arg1[%c0, %c0_0] : memref<8x128xf32, #tpu.memory_space<vmem>>, vector<8x128xf32>
    %c0_1 = arith.constant 0 : index
    %c0_2 = arith.constant 0 : index
    %1 = vector.load %arg2[%c0_1, %c0_2] : memref<128x256xf32, #tpu.memory_space<vmem>>, vector<128x256xf32>
    %cst = arith.constant dense<0.000000e+00> : vector<8x256xf32>
    %2 = tpu.matmul %0, %1, %cst {dimension_numbers = #tpu.dot_dimension_numbers<[1], [0], [0], [1], [0, 0, 1, 1], [], []>} : vector<8x128xf32>, vector<128x256xf32>, vector<8x256xf32> -> vector<8x256xf32>
    %c0_3 = arith.constant 0 : index
    %c0_4 = arith.constant 0 : index
    %3 = vector.load %arg3[%c0_3, %c0_4] : memref<8x256xf32, #tpu.memory_space<vmem>>, vector<8x256xf32>
    tpu.vector_store %arg3[%c0_3, %c0_4], %2 {strides = array<i32>} : memref<8x256xf32, #tpu.memory_space<vmem>>, vector<8x256xf32>,
    return
  }
  func.func @transform_0(%arg0: i32) -> (i32, i32) {
    %c0_i32 = arith.constant 0 : i32
    %c0_i32_0 = arith.constant 0 : i32
    return %arg0, %c0_i32 : i32, i32
  }
  func.func @transform_1(%arg0: i32) -> (i32, i32) {
    %c0_i32 = arith.constant 0 : i32
    %c0_i32_0 = arith.constant 0 : i32
    %c0_i32_1 = arith.constant 0 : i32
    return %c0_i32, %c0_i32_0 : i32, i32
  }
  func.func @transform_2(%arg0: i32) -> (i32, i32) {
    %c0_i32 = arith.constant 0 : i32
    %c0_i32_0 = arith.constant 0 : i32
    return %arg0, %c0_i32 : i32, i32
  }
}

</mosaic_0001>

<bundles_post_ra>
// kernel: custom-call
= control target key start
LH: loop header
LB: loop body
LE: loop exit
PB: predicated region body
PF: predicated region fallthrough
CT: control target
= control target key end

     0   :  { %s126_s0 = inlined_call_operand.vmem [shape: f32[2,4,16,16], index: 0, kind: input, shape index: {}]   ;;  %s127_s1 = inlined_call_operand.vmem [shape: f32[2,4,16,16], index: 1, kind: input, shape index: {}]   ;;  %s128_s2 = inlined_call_operand.hbm [shape: c64[2,4,16,16], index: 2, kind: output, shape index: {}]  }
   0x1   :  { %s87_s11 = scalar_lea.hbm %s128_s2, 2048 }
   0x2   :  { %4 = vsyncpa [#allocation0], 0  ;;  %s5_s14 = sshll.u32 %s126_s0, 4  ;;  %s6_s14 = int_to_ptr.vmem [resolvable:$true] %s5_s14 }
   0x3   :  { %s18_s15 = scalar_lea.vmem %s6_s14, 2048  ;;  %p23_p1 = scmp.lt.s32.totalorder %s6_s14, %s6_s14 }
   0x4   :  { %p19_p0 = scmp.ne.s32.totalorder %s6_s14, %s18_s15  ;;  %p24_p2 = scmp.lt.s32.totalorder %s18_s15, %s18_s15 }
   0x6   :  { %p25_p3 = por %p24_p2, %p23_p1 }
   0x8   :  { %p26_p4 = pnand %p25_p3, %p19_p0 }
   0xa   :  { %29 = shalt.err (!%p26_p4)  }
   0xb   :  { %p31_p5 = scmp.ne.s32.totalorder %s128_s2, %s87_s11  ;;  %s32_s0 = scalar_lea.hbm %s128_s2, 4096 }
   0xc   :  { %p33_p6 = scmp.lt.u32.totalorder %s32_s0, %s87_s11  ;;  %p34_p7 = scmp.lt.u32.totalorder %s87_s11, %s128_s2 }
   0xe   :  { %p35_p8 = por %p34_p7, %p33_p6 }
  0x10   :  { %p36_p9 = pnand %p35_p8, %p31_p5 }
  0x12   :  { %39 = shalt.err (!%p36_p9)  }
  0x13   :  { %8 = dma.vmem_to_hbm [thread:$0]  %s6_s14, 2048, %s128_s2, [#allocation0] }
  0x14   :  { %65 = dma.done.wait [#allocation0], 2048  }
  0x15   :  { %66 = vsyncadd [#allocation0], 4294965248 }
  0x16   :  { %10 = vsyncpa [#allocation0], 1 }
  0x17   :  { %11 = vsyncpa [#allocation1], 0  ;;  %s12_s28 = sshll.u32 %s127_s1, 4  ;;  %s13_s28 = int_to_ptr.vmem [resolvable:$true] %s12_s28 }
  0x18   :  { %s40_s29 = scalar_lea.vmem %s13_s28, 2048  ;;  %p45_p11 = scmp.lt.s32.totalorder %s13_s28, %s13_s28 }
  0x19   :  { %p41_p10 = scmp.ne.s32.totalorder %s13_s28, %s40_s29  ;;  %p46_p12 = scmp.lt.s32.totalorder %s40_s29, %s40_s29 }
  0x1b   :  { %p47_p13 = por %p46_p12, %p45_p11 }
  0x1d   :  { %p48_p0 = pnand %p47_p13, %p41_p10 }
  0x1f   :  { %51 = shalt.err (!%p48_p0)  }
  0x20   :  { %p53_p1 = scmp.ne.s32.totalorder %s87_s11, %s32_s0  ;;  %p56_p2 = scmp.lt.u32.totalorder %s32_s0, %s32_s0 }
  0x22   :  { %p57_p3 = por %p56_p2, %p34_p7 }
  0x24   :  { %p59_p4 = por %p57_p3, %p33_p6 }
  0x26   :  { %p60_p5 = pnand %p59_p4, %p53_p1 }
  0x28   :  { %63 = shalt.err (!%p60_p5)  }
  0x29   :  { %15 = dma.vmem_to_hbm [thread:$0]  %s13_s28, 2048, %s87_s11, [#allocation1] }
  0x2a   :  { %67 = dma.done.wait [#allocation1], 2048  }
  0x2b   :  { %68 = vsyncadd [#allocation1], 4294965248 }
  0x2c   :  { %17 = vsyncpa [#allocation1], 1 }

// kernel: _dft_layer_impl.1
= control target key start
LH: loop header
LB: loop body
LE: loop exit
PB: predicated region body
PF: predicated region fallthrough
CT: control target
= control target key end

     0   :  { %s378_s9 = smov 0   ;;  %s495_s0 = inlined_call_operand.vmem [shape: f32[16,128], index: 0, kind: input, shape index: {}]   ;;  %s496_s1 = inlined_call_operand.vmem [shape: f32[128,256], index: 1, kind: input, shape index: {}]   ;;  %s497_s2 = inlined_call_operand.vmem [shape: f32[16,256], index: 2, kind: output, shape index: {}]  }
   0x1 LB: > { %s302_s10 = sadd.s32 4294967295, %s360_s9   ;;  %p306_p0 = scmp.ge.s32.totalorder %s360_s9, 1  ;;  %s360_s9 = sphi %s378_s9, %s12_s9  }
   0x2   : > { %p111_p1 = scmp.lt.s32.totalorder %s360_s9, 3 }
   0x4   : > { %p112_p2 = pnand %p306_p0, %p111_p1 }
   0x5   : > { %v143_v0 = vld [vmem:[%s496_s1 + $0x8] sm:$0xff] (!%p112_p2)  ;;  %v145_v1 = vld [vmem:[%s496_s1 + $0x18] sm:$0xff] (!%p112_p2)  ;;  %v142_v2 = vld [vmem:[%s496_s1] sm:$0xff] (!%p112_p2)  ;;  %v362_v7 = vmov (!%p112_p2), 0.0   ;;  %p132_p3 = scmp.lt.s32.totalorder (!%p112_p2), %s302_s10, 1 }
   0x6   : > { %115 = sbr.rel (%p112_p2) target bundleno = 254 (0xfe), region = 28  ;;  %v313_v3 = vpack.c.bf16 (!%p112_p2), %v145_v1, %v143_v0  ;;  %v144_v4 = vld [vmem:[%s496_s1 + $0x10] sm:$0xff] (!%p112_p2)  ;;  %v147_v5 = vld [vmem:[%s496_s1 + $0x28] sm:$0xff] (!%p112_p2)  ;;  %v149_v6 = vld [vmem:[%s496_s1 + $0x38] sm:$0xff] (!%p112_p2)  ;;  %238 = vmatprep.mubr.f32.mxu0 (!%p112_p2), %v362_v7 }
   0x7   : > { %v315_v8 = vpack.c.bf16 (!%p112_p2), %v144_v4, %v142_v2  ;;  %v317_v9 = vpack.c.bf16 (!%p112_p2), %v149_v6, %v147_v5  ;;  %v146_v10 = vld [vmem:[%s496_s1 + $0x20] sm:$0xff] (!%p112_p2)  ;;  %v148_v11 = vld [vmem:[%s496_s1 + $0x30] sm:$0xff] (!%p112_p2)  ;;  %v151_v12 = vld [vmem:[%s496_s1 + $0x48] sm:$0xff] (!%p112_p2) }
   0x8   : > { %314 = vmatprep.subr.bf16.mxu0 (!%p112_p2), %v313_v3  ;;  %v153_v13 = vld [vmem:[%s496_s1 + $0x58] sm:$0xff] (!%p112_p2)  ;;  %v319_v14 = vpack.c.bf16 (!%p112_p2), %v148_v11, %v146_v10  ;;  %v150_v16 = vld [vmem:[%s496_s1 + $0x40] sm:$0xff] (!%p112_p2)  ;;  %v152_v17 = vld [vmem:[%s496_s1 + $0x50] sm:$0xff] (!%p112_p2) }
   0x9   : > { %316 = vmatpush1.bf16.msra.mxu0 (!%p112_p2), %v315_v8  ;;  %v321_v15 = vpack.c.bf16 (!%p112_p2), %v153_v13, %v151_v12  ;;  %v155_v18 = vld [vmem:[%s496_s1 + $0x68] sm:$0xff] (!%p112_p2)  ;;  %v157_v19 = vld [vmem:[%s496_s1 + $0x78] sm:$0xff] (!%p112_p2)  ;;  %v323_v20 = vpack.c.bf16 (!%p112_p2), %v152_v17, %v150_v16  ;;  %v154_v22 = vld [vmem:[%s496_s1 + $0x60] sm:$0xff] (!%p112_p2) }
   0xa   : > { %318 = vmatprep.subr.bf16.mxu0 (!%p112_p2), %v317_v9  ;;  %v325_v21 = vpack.c.bf16 (!%p112_p2), %v157_v19, %v155_v18  ;;  %v156_v23 = vld [vmem:[%s496_s1 + $0x70] sm:$0xff] (!%p112_p2)  ;;  %v159_v24 = vld [vmem:[%s496_s1 + $0x88] sm:$0xff] (!%p112_p2)  ;;  %v161_v25 = vld [vmem:[%s496_s1 + $0x98] sm:$0xff] (!%p112_p2) }
   0xb   : > { %v327_v26 = vpack.c.bf16 (!%p112_p2), %v156_v23, %v154_v22  ;;  %v329_v27 = vpack.c.bf16 (!%p112_p2), %v161_v25, %v159_v24  ;;  %v158_v28 = vld [vmem:[%s496_s1 + $0x80] sm:$0xff] (!%p112_p2)  ;;  %v160_v29 = vld [vmem:[%s496_s1 + $0x90] sm:$0xff] (!%p112_p2)  ;;  %v163_v30 = vld [vmem:[%s496_s1 + $0xa8] sm:$0xff] (!%p112_p2) }
   0xc   : > { %v165_v31 = vld [vmem:[%s496_s1 + $0xb8] sm:$0xff] (!%p112_p2)  ;;  %v331_v32 = vpack.c.bf16 (!%p112_p2), %v160_v29, %v158_v28  ;;  %v162_v34 = vld [vmem:[%s496_s1 + $0xa0] sm:$0xff] (!%p112_p2)  ;;  %v164_v35 = vld [vmem:[%s496_s1 + $0xb0] sm:$0xff] (!%p112_p2) }
   0xd   : > { %320 = vmatpush1.bf16.msra.mxu0 %v319_v14  ;;  %v333_v33 = vpack.c.bf16 %v165_v31, %v163_v30  ;;  %v167_v36 = vld [vmem:[%s496_s1 + $0xc8] sm:$0xff]  ;;  %v169_v37 = vld [vmem:[%s496_s1 + $0xd8] sm:$0xff]  ;;  %v335_v38 = vpack.c.bf16 %v164_v35, %v162_v34  ;;  %v166_v40 = vld [vmem:[%s496_s1 + $0xc0] sm:$0xff]  ;;  %s499_s10 = smov (!%p132_p3, %s302_s10), 1 }
   0xe   : > { %322 = vmatprep.subr.bf16.mxu0 %v321_v15  ;;  %v337_v39 = vpack.c.bf16 %v169_v37, %v167_v36  ;;  %v168_v41 = vld [vmem:[%s496_s1 + $0xd0] sm:$0xff]  ;;  %v171_v42 = vld [vmem:[%s496_s1 + $0xe8] sm:$0xff]  ;;  %v173_v43 = vld [vmem:[%s496_s1 + $0xf8] sm:$0xff]  ;;  %s307_s23 = sshll.u32 %s499_s10, 3  ;;  %s312_s27 = sshll.u32 %s499_s10, 4 }
   0xf   : > { %v339_v44 = vpack.c.bf16 %v168_v41, %v166_v40  ;;  %v341_v45 = vpack.c.bf16 %v173_v43, %v171_v42  ;;  %v170_v46 = vld [vmem:[%s496_s1 + $0xe0] sm:$0xff]  ;;  %v172_v47 = vld [vmem:[%s496_s1 + $0xf0] sm:$0xff]  ;;  %s135_s26 = scalar_lea.vmem %s495_s0, %s307_s23  ;;  %s140_s30 = scalar_lea.vmem %s497_s2, %s312_s27 }
  0x10   : > { %v343_v48 = vpack.c.bf16 %v172_v47, %v170_v46  ;;  %v141_v49 = vld [vmem:[%s135_s26] sm:$0xff] }
  0x11   : > { %324 = vmatpush1.bf16.msra.mxu0 %v323_v20 }
  0x12   : > { %326 = vmatprep.subr.bf16.mxu0 %v325_v21 }
  0x15   : > { %328 = vmatpush1.bf16.msra.mxu0 %v327_v26 }
  0x16   : > { %330 = vmatprep.subr.bf16.mxu0 %v329_v27 }
  0x19   : > { %332 = vmatpush1.bf16.msra.mxu0 %v331_v32 }
  0x1a   : > { %334 = vmatprep.subr.bf16.mxu0 %v333_v33 }
  0x1d   : > { %336 = vmatpush1.bf16.msra.mxu0 %v335_v38 }
  0x1e   : > { %338 = vmatprep.subr.bf16.mxu0 %v337_v39 }
  0x21   : > { %340 = vmatpush1.bf16.msra.mxu0 %v339_v44 }
  0x22   : > { %342 = vmatprep.subr.bf16.mxu0 %v341_v45 }
  0x25   : > { %344 = vmatpush1.bf16.msra.mxu0 %v343_v48 }
  0x28   : > { %239 = vmatmul.mubr.f32.vlgmr.msra.gmra.mrb[0].mxu0 %v141_v49 }
  0xfb   : > { %v240_v50 = vpop.f32.mrb[0].mxu0 }
  0xfc   : > { %245 = vst [vmem:[%s140_s30] sm:$0xff] %v240_v50  ;;  %v242_v51 = vpop.f32.mrb[1].mxu0 }
  0xfd   : > { %246 = vst [vmem:[%s140_s30 + $0x8] sm:$0xff] %v242_v51 }
  0xfe PF: > { %s12_s9 = sadd.s32 1, %s360_s9  }
  0xff   : > { %p9_p4 = scmp.ge.s32.totalorder %s12_s9, 4  }
 0x101   :  { %11 = sbr.rel (!%p9_p4) target bundleno = 1 (0x1), region = 58 }

</bundles_post_ra>
